<compile_context>
chip_gen: v6e
topology: v6e:2x2x1
jax: 0.10.0
libtpu: 0.0.40
codegen_flags: <defaults>
</compile_context>

<pallas_src>
import warnings

import jax
import jax.numpy as jnp
from jax.experimental import pallas as pl
from jax.experimental.pallas import tpu as pltpu


def _round_up(x: int, m: int) -> int:
    return (x + m - 1) // m * m


def _flash3d_fused_kernel(x_ref, w_ref, b_ref, o_ref):
    # One MXU matmul per tile: packed coords (tile_m, kp) @ block-diagonal
    # fused weight (kp, lane_w) -> lane-dense (tile_m, lane_w) tile, plus a
    # broadcast bias.  Accumulate in f32, store in output dtype (bf16/f32).
    acc = jnp.dot(x_ref[...], w_ref[...], preferred_element_type=jnp.float32)
    o_ref[...] = (acc + b_ref[...].astype(jnp.float32)).astype(o_ref.dtype)


def _flash3d_forward(coords, input_feat, seps, params, *,
                     tile_points=32768, out_dtype=jnp.bfloat16,
                     lane_target=512):
    """Fused Flash3D leaf-path forward: (coords @ We + be) @ Wp + bp."""
    # Match the PyTorch signature; input_feat is unused by Flash3D.forward,
    # seps only feeds the (unavailable) PSH hashing / attention stages.
    del input_feat, seps
    n, k = coords.shape
    w_emb, b_emb = params["w_emb"], params["b_emb"]
    w_proj, b_proj = params["w_proj"], params["b_proj"]
    out_dim = w_proj.shape[1]

    # --- Exact algebraic fusion of the two bias-only linears (tiny, wrapper-side).
    hi = jax.lax.Precision.HIGHEST
    w_fused = jnp.dot(w_emb, w_proj, precision=hi)            # (k, out_dim)
    b_fused = jnp.dot(b_emb, w_proj, precision=hi) + b_proj   # (1, out_dim)

    # --- Lane-dense packing: fold `pack` consecutive points into one row whose
    # width is a multiple of 128 lanes (target ~lane_target lanes).
    if out_dim <= 128 and 128 % out_dim == 0:
        base = 128 // out_dim
        pack = base * max(1, lane_target // (base * out_dim))
    else:
        warnings.warn(
            "Flash3D pallas: out_dim does not divide 128; falling back to "
            "unpacked layout with masked (partial-lane) stores — large perf cliff.")
        pack = 1
    lane_w = pack * out_dim
    kp = pack * k
    if pack > 1:
        # Block-diagonal expansion: each point in a packed row only sees its
        # own coords.  kron(I_pack, W_fused) is exactly that.
        w_big = jnp.kron(jnp.eye(pack, dtype=w_fused.dtype), w_fused)   # (kp, lane_w)
        b_big = jnp.tile(b_fused, (1, pack))                            # (1, lane_w)
    else:
        w_big, b_big = w_fused, b_fused

    # --- Pad only to a multiple of `pack` (at most pack-1 rows), NOT to a
    # whole tile: the grid's final block may be partial and Pallas masks its
    # out-of-bounds writeback.
    n_pad = _round_up(n, pack)
    if n_pad != n:
        coords = jnp.pad(coords, ((0, n_pad - n), (0, 0)))
    m_rows = n_pad // pack
    x_packed = coords.reshape(m_rows, kp)            # free row-major relabel

    # --- Tile sizing: ~tile_points points per grid step (rows multiple of 8).
    tile_m = max(8, _round_up(max(tile_points // pack, 1), 8))
    tile_m = min(tile_m, _round_up(m_rows, 8))
    if m_rows > 8:
        # If everything would fit in one step, split in two so v7x's two
        # TensorCores ("parallel" grid axis) both get work.
        tile_m = min(tile_m, _round_up(pl.cdiv(m_rows, 2), 8))
    grid = (pl.cdiv(m_rows, tile_m),)

    out_packed = pl.pallas_call(
        _flash3d_fused_kernel,
        out_shape=jax.ShapeDtypeStruct((m_rows, lane_w), out_dtype),
        grid_spec=pltpu.PrefetchScalarGridSpec(
            num_scalar_prefetch=0,
            grid=grid,
            in_specs=[
                # NOTE: add pipeline_mode=pl.Buffered(3) here if profiling on
                # v7x shows exposed input DMA at short (~1 us) steps.
                pl.BlockSpec((tile_m, kp),   lambda i: (i, 0)),  # packed coords tile
                pl.BlockSpec((kp, lane_w),   lambda i: (0, 0)),  # fused weight (resident)
                pl.BlockSpec((1, lane_w),    lambda i: (0, 0)),  # fused bias (resident)
            ],
            out_specs=pl.BlockSpec((tile_m, lane_w), lambda i: (i, 0)),
        ),
        compiler_params=pltpu.CompilerParams(
            dimension_semantics=("parallel",),
            vmem_limit_bytes=48 * 1024 * 1024,   # headroom; < v7x 64 MiB physical
        ),
    )(x_packed, w_big, b_big)

    # Free row-major relabel back to point-major [N, out_dim]; drop pad rows
    # (fuses into the consumer under jit).
    out = out_packed.reshape(n_pad, out_dim)
    return out[:n] if n_pad != n else out


# jit so the pad/reshape/slice and the tiny fusion/kron ops fuse with the
# pallas_call instead of dispatching eagerly.
flash3d_forward = jax.jit(
    _flash3d_forward, static_argnames=("tile_points", "out_dtype", "lane_target"))


if __name__ == "__main__":
    key = jax.random.PRNGKey(0)
    k_c, k_f, k_we, k_be, k_wp, k_bp, k_c2 = jax.random.split(key, 7)

    # Small, module-consistent shapes
    N = 4096           # number of points
    COORD_DIM = 3      # 3D coordinates
    EMB_CHANN = 32     # level_specs[0].encoder_specs[0].channels
    DEC_CHANN = 32     # level_specs[0].decoder_specs[0].channels

    coords = jax.random.normal(k_c, (N, COORD_DIM), jnp.float32)
    input_feat = jax.random.normal(k_f, (N, EMB_CHANN), jnp.float32)  # unused by forward
    seps = jnp.array([0, N // 2, N], jnp.int32)                       # batch separators

    # Deterministic parameter init (synthetic; shapes from module __init__)
    params = {
        "w_emb":  jax.random.normal(k_we, (COORD_DIM, EMB_CHANN), jnp.float32) * 0.1,
        "b_emb":  jax.random.normal(k_be, (1, EMB_CHANN), jnp.float32) * 0.1,
        "w_proj": jax.random.normal(k_wp, (EMB_CHANN, DEC_CHANN), jnp.float32) * 0.1,
        "b_proj": jax.random.normal(k_bp, (1, DEC_CHANN), jnp.float32) * 0.1,
    }

    def ref_fn(c):
        return (c @ params["w_emb"] + params["b_emb"]) @ params["w_proj"] + params["b_proj"]

    # 1) f32-output path: exact-precision check against the JAX reference.
    out = jax.block_until_ready(
        flash3d_forward(coords, input_feat, seps, params, out_dtype=jnp.float32))
    assert out.shape == (N, DEC_CHANN)
    assert jnp.allclose(out, ref_fn(coords), atol=1e-4, rtol=1e-4), "mismatch vs JAX reference"

    # 2) Ragged point count (not a multiple of pack=16 or the tile) with the
    #    default bf16 output: exercises the pad-to-pack + partial-block path.
    N2 = 1003
    coords2 = jax.random.normal(k_c2, (N2, COORD_DIM), jnp.float32)
    out2 = jax.block_until_ready(flash3d_forward(coords2, None, None, params))
    assert out2.shape == (N2, DEC_CHANN)
    assert out2.dtype == jnp.bfloat16
    assert jnp.allclose(out2.astype(jnp.float32), ref_fn(coords2),
                        atol=2e-2, rtol=2e-2), "ragged-N / bf16 mismatch"

    print("KERNEL_OK")
</pallas_src>

<mosaic_0001>
module attributes {stable_mosaic.version = 11 : i64} {
  func.func @_flash3d_fused_kernel(%arg0: i32, %arg1: memref<128x48xf32, #tpu.memory_space<vmem>>, %arg2: memref<48x512xf32, #tpu.memory_space<vmem>>, %arg3: memref<1x512xf32, #tpu.memory_space<vmem>>, %arg4: memref<128x512xf32, #tpu.memory_space<vmem>>) attributes {dimension_semantics = [#tpu.dimension_semantics<parallel>], iteration_bounds = array<i64: 2>, scalar_prefetch = 0 : i64, scratch_operands = 0 : i64, tpu.core_type = #tpu.core_type<tc>, window_params = [{transform_indices = @transform_0, window_bounds = array<i64: 128, 48>}, {pipeline_mode = #tpu.pipeline_mode<synchronous>, transform_indices = @transform_1, window_bounds = array<i64: 48, 512>}, {pipeline_mode = #tpu.pipeline_mode<synchronous>, transform_indices = @transform_2, window_bounds = array<i64: 1, 512>}, {transform_indices = @transform_3, window_bounds = array<i64: 128, 512>}]} {
    %c0 = arith.constant 0 : index
    %c0_0 = arith.constant 0 : index
    %0 = vector.load %arg1[%c0, %c0_0] : memref<128x48xf32, #tpu.memory_space<vmem>>, vector<128x48xf32>
    %c0_1 = arith.constant 0 : index
    %c0_2 = arith.constant 0 : index
    %1 = vector.load %arg2[%c0_1, %c0_2] : memref<48x512xf32, #tpu.memory_space<vmem>>, vector<48x512xf32>
    %cst = arith.constant dense<0.000000e+00> : vector<128x512xf32>
    %2 = tpu.matmul %0, %1, %cst {dimension_numbers = #tpu.dot_dimension_numbers<[1], [0], [0], [1], [0, 0, 1, 1], [], []>} : vector<128x48xf32>, vector<48x512xf32>, vector<128x512xf32> -> vector<128x512xf32>
    %c0_3 = arith.constant 0 : index
    %c0_4 = arith.constant 0 : index
    %3 = vector.load %arg3[%c0_3, %c0_4] : memref<1x512xf32, #tpu.memory_space<vmem>>, vector<1x512xf32>
    %4 = vector.broadcast %3 : vector<1x512xf32> to vector<128x512xf32>
    %5 = arith.addf %2, %4 : vector<128x512xf32>
    %c0_5 = arith.constant 0 : index
    %c0_6 = arith.constant 0 : index
    %6 = vector.load %arg4[%c0_5, %c0_6] : memref<128x512xf32, #tpu.memory_space<vmem>>, vector<128x512xf32>
    tpu.vector_store %arg4[%c0_5, %c0_6], %5 {strides = array<i32>} : memref<128x512xf32, #tpu.memory_space<vmem>>, vector<128x512xf32>,
    return
  }
  func.func @transform_0(%arg0: i32) -> (i32, i32) {
    %c0_i32 = arith.constant 0 : i32
    %c0_i32_0 = arith.constant 0 : i32
    return %arg0, %c0_i32 : i32, i32
  }
  func.func @transform_1(%arg0: i32) -> (i32, i32) {
    %c0_i32 = arith.constant 0 : i32
    %c0_i32_0 = arith.constant 0 : i32
    %c0_i32_1 = arith.constant 0 : i32
    return %c0_i32, %c0_i32_0 : i32, i32
  }
  func.func @transform_2(%arg0: i32) -> (i32, i32) {
    %c0_i32 = arith.constant 0 : i32
    %c0_i32_0 = arith.constant 0 : i32
    %c0_i32_1 = arith.constant 0 : i32
    return %c0_i32, %c0_i32_0 : i32, i32
  }
  func.func @transform_3(%arg0: i32) -> (i32, i32) {
    %c0_i32 = arith.constant 0 : i32
    %c0_i32_0 = arith.constant 0 : i32
    return %arg0, %c0_i32 : i32, i32
  }
}

</mosaic_0001>

<bundles_post_ra>
// kernel: _flash3d_forward.1
= control target key start
LH: loop header
LB: loop body
LE: loop exit
PB: predicated region body
PF: predicated region fallthrough
CT: control target
= control target key end

     0   :  { %s814_s12 = smov 0   ;;  %s1130_s0 = inlined_call_operand.vmem [shape: f32[256,48], index: 0, kind: input, shape index: {}]   ;;  %s1131_s1 = inlined_call_operand.vmem [shape: f32[48,512], index: 1, kind: input, shape index: {}]   ;;  %s1132_s2 = inlined_call_operand.vmem [shape: f32[1,512], index: 2, kind: input, shape index: {}]   ;;  %s1133_s3 = inlined_call_operand.vmem [shape: f32[256,512], index: 3, kind: output, shape index: {}]  }
   0x1 LB: > { %s731_s13 = sadd.s32 4294967295, %s791_s12   ;;  %p735_p0 = scmp.ge.s32.totalorder %s791_s12, 1  ;;  %s791_s12 = sphi %s814_s12, %s13_s12  }
   0x2   : > { %p138_p1 = scmp.lt.s32.totalorder %s791_s12, 3 }
   0x4   : > { %p139_p2 = pnand %p735_p0, %p138_p1 }
   0x5   : > { %s736_s20 = sshll.u32 (!%p139_p2), %s731_s13, 4 }
   0x6   : > { %142 = sbr.rel (%p139_p2) target bundleno = 283 (0x11b), region = 32  ;;  %p164_p3 = scmp.lt.s32.totalorder (!%p139_p2), %s736_s20, 31 }
   0xb   : > { %v213_v0 = vld [vmem:[%s1131_s1 + $0xa8] sm:$0xff]  ;;  %v215_v1 = vld [vmem:[%s1131_s1 + $0xb8] sm:$0xff]  ;;  %v212_v2 = vld [vmem:[%s1131_s1 + $0xa0] sm:$0xff]  ;;  %s1135_s20 = smov (!%p164_p3, %s736_s20), 31  ;;  %vm238_vm0 = vcmask 392192   ;;  %v793_v25 = vmov 0.0   ;;  %v218_v41 = vlaneseq }
   0xc   : > { %307 = vmatprep.subr.mxu0 %v213_v0  ;;  %468 = vmatprep.subr.mxu1 %v215_v1  ;;  %v214_v3 = vld [vmem:[%s1131_s1 + $0xb0] sm:$0xff]  ;;  %v209_v4 = vld [vmem:[%s1131_s1 + $0x88] sm:$0xff]  ;;  %v211_v5 = vld [vmem:[%s1131_s1 + $0x98] sm:$0xff]  ;;  %s737_s22 = sshll.u32 %s1135_s20, 3  ;;  %s775_s18 = sshll.u32 %s1135_s20, 5 }
   0xd   : > { %308 = vmatpush1.msra.mxu0 %v212_v2  ;;  %469 = vmatpush1.msra.mxu1 %v214_v3  ;;  %v208_v6 = vld [vmem:[%s1131_s1 + $0x80] sm:$0xff]  ;;  %v210_v7 = vld [vmem:[%s1131_s1 + $0x90] sm:$0xff]  ;;  %v205_v8 = vld [vmem:[%s1131_s1 + $0x68] sm:$0xff]  ;;  %s894_s10 = scalar_lea.vmem %s1130_s0, %s737_s22  ;;  %v219_v42 = vshrl.u32 %v218_v41, 7  ;;  %s997_s22 = scalar_lea.vmem %s1133_s3, %s775_s18 }
   0xe   : > { %309 = vmatprep.subr.mxu0 %v209_v4  ;;  %470 = vmatprep.subr.mxu1 %v211_v5  ;;  %v207_v9 = vld [vmem:[%s1131_s1 + $0x78] sm:$0xff]  ;;  %v204_v10 = vld [vmem:[%s1131_s1 + $0x60] sm:$0xff]  ;;  %v206_v11 = vld [vmem:[%s1131_s1 + $0x70] sm:$0xff] }
   0xf   : > { %310 = vmatpush1.msra.mxu0 %v208_v6  ;;  %471 = vmatpush1.msra.mxu1 %v210_v7  ;;  %v201_v12 = vld [vmem:[%s1131_s1 + $0x48] sm:$0xff]  ;;  %v203_v13 = vld [vmem:[%s1131_s1 + $0x58] sm:$0xff]  ;;  %v200_v14 = vld [vmem:[%s1131_s1 + $0x40] sm:$0xff]  ;;  %v220_v43 = vsub.s32 0, %v219_v42  ;;  %v228_v44 = vsub.s32 2, %v219_v42  ;;  %v224_v46 = vsub.s32 1, %v219_v42 }
  0x10   : > { %311 = vmatprep.subr.mxu0 %v205_v8  ;;  %472 = vmatprep.subr.mxu1 %v207_v9  ;;  %v202_v15 = vld [vmem:[%s1131_s1 + $0x50] sm:$0xff]  ;;  %v197_v16 = vld [vmem:[%s1131_s1 + $0x28] sm:$0xff]  ;;  %v199_v17 = vld [vmem:[%s1131_s1 + $0x38] sm:$0xff]  ;;  %v232_v47 = vsub.s32 3, %v219_v42 }
  0x11   : > { %312 = vmatpush1.msra.mxu0 %v204_v10  ;;  %473 = vmatpush1.msra.mxu1 %v206_v11  ;;  %v196_v18 = vld [vmem:[%s1131_s1 + $0x20] sm:$0xff]  ;;  %v198_v19 = vld [vmem:[%s1131_s1 + $0x30] sm:$0xff]  ;;  %v193_v20 = vld [vmem:[%s1131_s1 + $0x8] sm:$0xff] }
  0x12   : > { %313 = vmatprep.subr.mxu0 %v201_v12  ;;  %474 = vmatprep.subr.mxu1 %v203_v13  ;;  %v195_v21 = vld [vmem:[%s1131_s1 + $0x18] sm:$0xff]  ;;  %v192_v22 = vld [vmem:[%s1131_s1] sm:$0xff]  ;;  %v194_v23 = vld [vmem:[%s1131_s1 + $0x10] sm:$0xff] }
  0x13   : > { %314 = vmatpush1.msra.mxu0 %v200_v14  ;;  %475 = vmatpush1.msra.mxu1 %v202_v15  ;;  %v176_v24 = vld [vmem:[%s894_s10] sm:$0xff]  ;;  %v177_v26 = vld [vmem:[%s894_s10 + $0x8] sm:$0xff]  ;;  %v178_v27 = vld [vmem:[%s894_s10 + $0x10] sm:$0xff] }
  0x14   : > { %315 = vmatprep.subr.mxu0 %v197_v16  ;;  %476 = vmatprep.subr.mxu1 %v199_v17  ;;  %v179_v28 = vld [vmem:[%s894_s10 + $0x18] sm:$0xff]  ;;  %v180_v29 = vld [vmem:[%s894_s10 + $0x20] sm:$0xff]  ;;  %v181_v30 = vld [vmem:[%s894_s10 + $0x28] sm:$0xff] }
  0x15   : > { %316 = vmatpush1.msra.mxu0 %v196_v18  ;;  %477 = vmatpush1.msra.mxu1 %v198_v19  ;;  %v182_v31 = vld [vmem:[%s894_s10 + $0x30] sm:$0xff]  ;;  %v183_v32 = vld [vmem:[%s894_s10 + $0x38] sm:$0xff]  ;;  %v184_v33 = vld [vmem:[%s894_s10 + $0x40] sm:$0xff] }
  0x16   : > { %317 = vmatprep.subr.mxu0 %v193_v20  ;;  %478 = vmatprep.subr.mxu1 %v195_v21  ;;  %v185_v34 = vld [vmem:[%s894_s10 + $0x48] sm:$0xff]  ;;  %v186_v35 = vld [vmem:[%s894_s10 + $0x50] sm:$0xff]  ;;  %v187_v36 = vld [vmem:[%s894_s10 + $0x58] sm:$0xff] }
  0x17   : > { %318 = vmatpush1.msra.mxu0 %v192_v22  ;;  %351 = vmatprep.mubr.f32.mxu0 %v793_v25  ;;  %v188_v37 = vld [vmem:[%s894_s10 + $0x60] sm:$0xff]  ;;  %v189_v38 = vld [vmem:[%s894_s10 + $0x68] sm:$0xff]  ;;  %v190_v39 = vld [vmem:[%s894_s10 + $0x70] sm:$0xff] }
  0x18   : > { %479 = vmatpush1.msra.mxu1 %v194_v23  ;;  %512 = vmatprep.mubr.f32.mxu1 %v793_v25  ;;  %v191_v40 = vld [vmem:[%s894_s10 + $0x78] sm:$0xff]  ;;  %v216_v45 = vld [vmem:[%s1132_s2] sm:$0xf] }
  0x19   : > { %741 = vmatmul.mubr.msk.f32.vlgmr.msra.gmra.mxu0 %vm238_vm0, %v176_v24  ;;  %757 = vmatmul.mubr.msk.f32.vlgmr.msra.gmra.mxu1 %vm238_vm0, %v176_v24  ;;  %v986_v48 = vrot.slane %v216_v45, %v220_v43  ;;  %v988_v49 = vrot.slane %v216_v45, %v228_v44  ;;  %v990_v50 = vrot.slane %v216_v45, %v224_v46 }
  0x1a   : > { %357 = vmatprep.mubr.f32.mxu0 %v793_v25  ;;  %518 = vmatprep.mubr.f32.mxu1 %v793_v25  ;;  %v992_v51 = vrot.slane %v216_v45, %v232_v47 }
  0x1d   : > { %742 = vmatmul.mubr.msk.f32.gmra.mxu0 %vm238_vm0, %v177_v26  ;;  %758 = vmatmul.mubr.msk.f32.gmra.mxu1 %vm238_vm0, %v177_v26 }
  0x1e   : > { %363 = vmatprep.mubr.f32.mxu0 %v793_v25  ;;  %524 = vmatprep.mubr.f32.mxu1 %v793_v25 }
  0x21   : > { %743 = vmatmul.mubr.msk.f32.gmra.mxu0 %vm238_vm0, %v178_v27  ;;  %759 = vmatmul.mubr.msk.f32.gmra.mxu1 %vm238_vm0, %v178_v27 }
  0x22   : > { %369 = vmatprep.mubr.f32.mxu0 %v793_v25  ;;  %530 = vmatprep.mubr.f32.mxu1 %v793_v25 }
  0x25   : > { %744 = vmatmul.mubr.msk.f32.gmra.mxu0 %vm238_vm0, %v179_v28  ;;  %760 = vmatmul.mubr.msk.f32.gmra.mxu1 %vm238_vm0, %v179_v28 }
  0x26   : > { %375 = vmatprep.mubr.f32.mxu0 %v793_v25  ;;  %536 = vmatprep.mubr.f32.mxu1 %v793_v25 }
  0x29   : > { %745 = vmatmul.mubr.msk.f32.gmra.mxu0 %vm238_vm0, %v180_v29  ;;  %761 = vmatmul.mubr.msk.f32.gmra.mxu1 %vm238_vm0, %v180_v29 }
  0x2a   : > { %381 = vmatprep.mubr.f32.mxu0 %v793_v25  ;;  %542 = vmatprep.mubr.f32.mxu1 %v793_v25 }
  0x2d   : > { %746 = vmatmul.mubr.msk.f32.gmra.mxu0 %vm238_vm0, %v181_v30  ;;  %762 = vmatmul.mubr.msk.f32.gmra.mxu1 %vm238_vm0, %v181_v30 }
  0x2e   : > { %387 = vmatprep.mubr.f32.mxu0 %v793_v25  ;;  %548 = vmatprep.mubr.f32.mxu1 %v793_v25 }
  0x31   : > { %747 = vmatmul.mubr.msk.f32.gmra.mxu0 %vm238_vm0, %v182_v31  ;;  %763 = vmatmul.mubr.msk.f32.gmra.mxu1 %vm238_vm0, %v182_v31 }
  0x32   : > { %393 = vmatprep.mubr.f32.mxu0 %v793_v25  ;;  %554 = vmatprep.mubr.f32.mxu1 %v793_v25 }
  0x35   : > { %748 = vmatmul.mubr.msk.f32.gmra.mxu0 %vm238_vm0, %v183_v32  ;;  %764 = vmatmul.mubr.msk.f32.gmra.mxu1 %vm238_vm0, %v183_v32 }
  0x36   : > { %399 = vmatprep.mubr.f32.mxu0 %v793_v25  ;;  %560 = vmatprep.mubr.f32.mxu1 %v793_v25 }
  0x39   : > { %749 = vmatmul.mubr.msk.f32.gmra.mxu0 %vm238_vm0, %v184_v33  ;;  %765 = vmatmul.mubr.msk.f32.gmra.mxu1 %vm238_vm0, %v184_v33 }
  0x3a   : > { %405 = vmatprep.mubr.f32.mxu0 %v793_v25  ;;  %566 = vmatprep.mubr.f32.mxu1 %v793_v25 }
  0x3d   : > { %750 = vmatmul.mubr.msk.f32.gmra.mxu0 %vm238_vm0, %v185_v34  ;;  %766 = vmatmul.mubr.msk.f32.gmra.mxu1 %vm238_vm0, %v185_v34 }
  0x3e   : > { %411 = vmatprep.mubr.f32.mxu0 %v793_v25  ;;  %572 = vmatprep.mubr.f32.mxu1 %v793_v25 }
  0x41   : > { %751 = vmatmul.mubr.msk.f32.gmra.mxu0 %vm238_vm0, %v186_v35  ;;  %767 = vmatmul.mubr.msk.f32.gmra.mxu1 %vm238_vm0, %v186_v35 }
  0x42   : > { %417 = vmatprep.mubr.f32.mxu0 %v793_v25  ;;  %578 = vmatprep.mubr.f32.mxu1 %v793_v25 }
  0x45   : > { %752 = vmatmul.mubr.msk.f32.gmra.mxu0 %vm238_vm0, %v187_v36  ;;  %768 = vmatmul.mubr.msk.f32.gmra.mxu1 %vm238_vm0, %v187_v36 }
  0x46   : > { %423 = vmatprep.mubr.f32.mxu0 %v793_v25  ;;  %584 = vmatprep.mubr.f32.mxu1 %v793_v25 }
  0x49   : > { %753 = vmatmul.mubr.msk.f32.gmra.mxu0 %vm238_vm0, %v188_v37  ;;  %769 = vmatmul.mubr.msk.f32.gmra.mxu1 %vm238_vm0, %v188_v37 }
  0x4a   : > { %429 = vmatprep.mubr.f32.mxu0 %v793_v25  ;;  %590 = vmatprep.mubr.f32.mxu1 %v793_v25 }
  0x4d   : > { %754 = vmatmul.mubr.msk.f32.gmra.mxu0 %vm238_vm0, %v189_v38  ;;  %770 = vmatmul.mubr.msk.f32.gmra.mxu1 %vm238_vm0, %v189_v38 }
  0x4e   : > { %435 = vmatprep.mubr.f32.mxu0 %v793_v25  ;;  %596 = vmatprep.mubr.f32.mxu1 %v793_v25 }
  0x51   : > { %755 = vmatmul.mubr.msk.f32.gmra.mxu0 %vm238_vm0, %v190_v39  ;;  %771 = vmatmul.mubr.msk.f32.gmra.mxu1 %vm238_vm0, %v190_v39 }
  0x52   : > { %441 = vmatprep.mubr.f32.mxu0 %v793_v25  ;;  %602 = vmatprep.mubr.f32.mxu1 %v793_v25 }
  0x55   : > { %756 = vmatmul.mubr.msk.f32.gmra.mxu0 %vm238_vm0, %v191_v40  ;;  %772 = vmatmul.mubr.msk.f32.gmra.mxu1 %vm238_vm0, %v191_v40 }
  0xd9   : > { %v353_v52 = vpop.f32.mrf.mxu0  ;;  %v514_v53 = vpop.f32.mrf.mxu1 }
  0xda   : > { %v354_v54 = vadd.f32 %v353_v52, %v986_v48  ;;  %v515_v55 = vadd.f32 %v514_v53, %v988_v49 }
  0xdb   : > { %v355_v56 = vpop.f32.mrf.mxu0  ;;  %v516_v57 = vpop.f32.mrf.mxu1 }
  0xdc   : > { %609 = vst [vmem:[%s997_s22] sm:$0xff] %v354_v54  ;;  %611 = vst [vmem:[%s997_s22 + $0x10] sm:$0xff] %v515_v55  ;;  %v356_v58 = vadd.f32 %v355_v56, %v990_v50  ;;  %v517_v59 = vadd.f32 %v516_v57, %v992_v51 }
  0xdd   : > { %v359_v60 = vpop.f32.mrf.mxu0  ;;  %v520_v61 = vpop.f32.mrf.mxu1 }
  0xde   : > { %610 = vst [vmem:[%s997_s22 + $0x8] sm:$0xff] %v356_v58  ;;  %612 = vst [vmem:[%s997_s22 + $0x18] sm:$0xff] %v517_v59  ;;  %v360_v62 = vadd.f32 %v359_v60, %v986_v48  ;;  %v521_v63 = vadd.f32 %v520_v61, %v988_v49 }
  0xdf   : > { %v361_v0 = vpop.f32.mrf.mxu0  ;;  %v522_v1 = vpop.f32.mrf.mxu1 }
  0xe0   : > { %613 = vst [vmem:[%s997_s22 + $0x20] sm:$0xff] %v360_v62  ;;  %615 = vst [vmem:[%s997_s22 + $0x30] sm:$0xff] %v521_v63  ;;  %v362_v2 = vadd.f32 %v361_v0, %v990_v50  ;;  %v523_v3 = vadd.f32 %v522_v1, %v992_v51 }
  0xe1   : > { %v365_v4 = vpop.f32.mrf.mxu0  ;;  %v526_v5 = vpop.f32.mrf.mxu1 }
  0xe2   : > { %614 = vst [vmem:[%s997_s22 + $0x28] sm:$0xff] %v362_v2  ;;  %616 = vst [vmem:[%s997_s22 + $0x38] sm:$0xff] %v523_v3  ;;  %v366_v6 = vadd.f32 %v365_v4, %v986_v48  ;;  %v527_v7 = vadd.f32 %v526_v5, %v988_v49 }
  0xe3   : > { %v367_v8 = vpop.f32.mrf.mxu0  ;;  %v528_v9 = vpop.f32.mrf.mxu1 }
  0xe4   : > { %617 = vst [vmem:[%s997_s22 + $0x40] sm:$0xff] %v366_v6  ;;  %619 = vst [vmem:[%s997_s22 + $0x50] sm:$0xff] %v527_v7  ;;  %v368_v10 = vadd.f32 %v367_v8, %v990_v50  ;;  %v529_v11 = vadd.f32 %v528_v9, %v992_v51 }
  0xe5   : > { %v371_v12 = vpop.f32.mrf.mxu0  ;;  %v532_v13 = vpop.f32.mrf.mxu1 }
  0xe6   : > { %618 = vst [vmem:[%s997_s22 + $0x48] sm:$0xff] %v368_v10  ;;  %620 = vst [vmem:[%s997_s22 + $0x58] sm:$0xff] %v529_v11  ;;  %v372_v14 = vadd.f32 %v371_v12, %v986_v48  ;;  %v533_v15 = vadd.f32 %v532_v13, %v988_v49 }
  0xe7   : > { %v373_v16 = vpop.f32.mrf.mxu0  ;;  %v534_v17 = vpop.f32.mrf.mxu1 }
  0xe8   : > { %621 = vst [vmem:[%s997_s22 + $0x60] sm:$0xff] %v372_v14  ;;  %623 = vst [vmem:[%s997_s22 + $0x70] sm:$0xff] %v533_v15  ;;  %v374_v18 = vadd.f32 %v373_v16, %v990_v50  ;;  %v535_v19 = vadd.f32 %v534_v17, %v992_v51 }
  0xe9   : > { %v377_v20 = vpop.f32.mrf.mxu0  ;;  %v538_v21 = vpop.f32.mrf.mxu1 }
  0xea   : > { %622 = vst [vmem:[%s997_s22 + $0x68] sm:$0xff] %v374_v18  ;;  %624 = vst [vmem:[%s997_s22 + $0x78] sm:$0xff] %v535_v19  ;;  %v378_v22 = vadd.f32 %v377_v20, %v986_v48  ;;  %v539_v23 = vadd.f32 %v538_v21, %v988_v49 }
  0xeb   : > { %v379_v24 = vpop.f32.mrf.mxu0  ;;  %v540_v25 = vpop.f32.mrf.mxu1 }
  0xec   : > { %625 = vst [vmem:[%s997_s22 + $0x80] sm:$0xff] %v378_v22  ;;  %627 = vst [vmem:[%s997_s22 + $0x90] sm:$0xff] %v539_v23  ;;  %v380_v26 = vadd.f32 %v379_v24, %v990_v50  ;;  %v541_v27 = vadd.f32 %v540_v25, %v992_v51 }
  0xed   : > { %v383_v28 = vpop.f32.mrf.mxu0  ;;  %v544_v29 = vpop.f32.mrf.mxu1 }
  0xee   : > { %626 = vst [vmem:[%s997_s22 + $0x88] sm:$0xff] %v380_v26  ;;  %628 = vst [vmem:[%s997_s22 + $0x98] sm:$0xff] %v541_v27  ;;  %v384_v30 = vadd.f32 %v383_v28, %v986_v48  ;;  %v545_v31 = vadd.f32 %v544_v29, %v988_v49 }
  0xef   : > { %v385_v32 = vpop.f32.mrf.mxu0  ;;  %v546_v33 = vpop.f32.mrf.mxu1 }
  0xf0   : > { %629 = vst [vmem:[%s997_s22 + $0xa0] sm:$0xff] %v384_v30  ;;  %631 = vst [vmem:[%s997_s22 + $0xb0] sm:$0xff] %v545_v31  ;;  %v386_v34 = vadd.f32 %v385_v32, %v990_v50  ;;  %v547_v35 = vadd.f32 %v546_v33, %v992_v51 }
  0xf1   : > { %v389_v36 = vpop.f32.mrf.mxu0  ;;  %v550_v37 = vpop.f32.mrf.mxu1 }
  0xf2   : > { %630 = vst [vmem:[%s997_s22 + $0xa8] sm:$0xff] %v386_v34  ;;  %632 = vst [vmem:[%s997_s22 + $0xb8] sm:$0xff] %v547_v35  ;;  %v390_v38 = vadd.f32 %v389_v36, %v986_v48  ;;  %v551_v39 = vadd.f32 %v550_v37, %v988_v49 }
  0xf3   : > { %v391_v40 = vpop.f32.mrf.mxu0  ;;  %v552_v41 = vpop.f32.mrf.mxu1 }
  0xf4   : > { %633 = vst [vmem:[%s997_s22 + $0xc0] sm:$0xff] %v390_v38  ;;  %635 = vst [vmem:[%s997_s22 + $0xd0] sm:$0xff] %v551_v39  ;;  %v392_v42 = vadd.f32 %v391_v40, %v990_v50  ;;  %v553_v43 = vadd.f32 %v552_v41, %v992_v51 }
  0xf5   : > { %v395_v44 = vpop.f32.mrf.mxu0  ;;  %v556_v45 = vpop.f32.mrf.mxu1 }
  0xf6   : > { %634 = vst [vmem:[%s997_s22 + $0xc8] sm:$0xff] %v392_v42  ;;  %636 = vst [vmem:[%s997_s22 + $0xd8] sm:$0xff] %v553_v43  ;;  %v396_v46 = vadd.f32 %v395_v44, %v986_v48  ;;  %v557_v47 = vadd.f32 %v556_v45, %v988_v49 }
  0xf7   : > { %v397_v52 = vpop.f32.mrf.mxu0  ;;  %v558_v53 = vpop.f32.mrf.mxu1 }
  0xf8   : > { %637 = vst [vmem:[%s997_s22 + $0xe0] sm:$0xff] %v396_v46  ;;  %639 = vst [vmem:[%s997_s22 + $0xf0] sm:$0xff] %v557_v47  ;;  %v398_v54 = vadd.f32 %v397_v52, %v990_v50  ;;  %v559_v55 = vadd.f32 %v558_v53, %v992_v51 }
  0xf9   : > { %v401_v56 = vpop.f32.mrf.mxu0  ;;  %v562_v57 = vpop.f32.mrf.mxu1 }
  0xfa   : > { %638 = vst [vmem:[%s997_s22 + $0xe8] sm:$0xff] %v398_v54  ;;  %640 = vst [vmem:[%s997_s22 + $0xf8] sm:$0xff] %v559_v55  ;;  %v402_v58 = vadd.f32 %v401_v56, %v986_v48  ;;  %v563_v59 = vadd.f32 %v562_v57, %v988_v49 }
  0xfb   : > { %v403_v60 = vpop.f32.mrf.mxu0  ;;  %v564_v61 = vpop.f32.mrf.mxu1 }
  0xfc   : > { %641 = vst [vmem:[%s997_s22 + $0x100] sm:$0xff] %v402_v58  ;;  %643 = vst [vmem:[%s997_s22 + $0x110] sm:$0xff] %v563_v59  ;;  %v404_v62 = vadd.f32 %v403_v60, %v990_v50  ;;  %v565_v63 = vadd.f32 %v564_v61, %v992_v51 }
  0xfd   : > { %v407_v0 = vpop.f32.mrf.mxu0  ;;  %v568_v1 = vpop.f32.mrf.mxu1 }
  0xfe   : > { %642 = vst [vmem:[%s997_s22 + $0x108] sm:$0xff] %v404_v62  ;;  %644 = vst [vmem:[%s997_s22 + $0x118] sm:$0xff] %v565_v63  ;;  %v408_v2 = vadd.f32 %v407_v0, %v986_v48  ;;  %v569_v3 = vadd.f32 %v568_v1, %v988_v49 }
  0xff   : > { %v409_v4 = vpop.f32.mrf.mxu0  ;;  %v570_v5 = vpop.f32.mrf.mxu1 }
 0x100   : > { %645 = vst [vmem:[%s997_s22 + $0x120] sm:$0xff] %v408_v2  ;;  %647 = vst [vmem:[%s997_s22 + $0x130] sm:$0xff] %v569_v3  ;;  %v410_v6 = vadd.f32 %v409_v4, %v990_v50  ;;  %v571_v7 = vadd.f32 %v570_v5, %v992_v51 }
 0x101   : > { %v413_v8 = vpop.f32.mrf.mxu0  ;;  %v574_v9 = vpop.f32.mrf.mxu1 }
 0x102   : > { %646 = vst [vmem:[%s997_s22 + $0x128] sm:$0xff] %v410_v6  ;;  %648 = vst [vmem:[%s997_s22 + $0x138] sm:$0xff] %v571_v7  ;;  %v414_v10 = vadd.f32 %v413_v8, %v986_v48  ;;  %v575_v11 = vadd.f32 %v574_v9, %v988_v49 }
 0x103   : > { %v415_v12 = vpop.f32.mrf.mxu0  ;;  %v576_v13 = vpop.f32.mrf.mxu1 }
 0x104   : > { %649 = vst [vmem:[%s997_s22 + $0x140] sm:$0xff] %v414_v10  ;;  %651 = vst [vmem:[%s997_s22 + $0x150] sm:$0xff] %v575_v11  ;;  %v416_v14 = vadd.f32 %v415_v12, %v990_v50  ;;  %v577_v15 = vadd.f32 %v576_v13, %v992_v51 }
 0x105   : > { %v419_v16 = vpop.f32.mrf.mxu0  ;;  %v580_v17 = vpop.f32.mrf.mxu1 }
 0x106   : > { %650 = vst [vmem:[%s997_s22 + $0x148] sm:$0xff] %v416_v14  ;;  %652 = vst [vmem:[%s997_s22 + $0x158] sm:$0xff] %v577_v15  ;;  %v420_v18 = vadd.f32 %v419_v16, %v986_v48  ;;  %v581_v19 = vadd.f32 %v580_v17, %v988_v49 }
 0x107   : > { %v421_v20 = vpop.f32.mrf.mxu0  ;;  %v582_v21 = vpop.f32.mrf.mxu1 }
 0x108   : > { %653 = vst [vmem:[%s997_s22 + $0x160] sm:$0xff] %v420_v18  ;;  %655 = vst [vmem:[%s997_s22 + $0x170] sm:$0xff] %v581_v19  ;;  %v422_v22 = vadd.f32 %v421_v20, %v990_v50  ;;  %v583_v23 = vadd.f32 %v582_v21, %v992_v51 }
 0x109   : > { %v425_v24 = vpop.f32.mrf.mxu0  ;;  %v586_v25 = vpop.f32.mrf.mxu1 }
 0x10a   : > { %654 = vst [vmem:[%s997_s22 + $0x168] sm:$0xff] %v422_v22  ;;  %656 = vst [vmem:[%s997_s22 + $0x178] sm:$0xff] %v583_v23  ;;  %v426_v26 = vadd.f32 %v425_v24, %v986_v48  ;;  %v587_v27 = vadd.f32 %v586_v25, %v988_v49 }
 0x10b   : > { %v427_v28 = vpop.f32.mrf.mxu0  ;;  %v588_v29 = vpop.f32.mrf.mxu1 }
 0x10c   : > { %657 = vst [vmem:[%s997_s22 + $0x180] sm:$0xff] %v426_v26  ;;  %659 = vst [vmem:[%s997_s22 + $0x190] sm:$0xff] %v587_v27  ;;  %v428_v30 = vadd.f32 %v427_v28, %v990_v50  ;;  %v589_v31 = vadd.f32 %v588_v29, %v992_v51 }
 0x10d   : > { %v431_v32 = vpop.f32.mrf.mxu0  ;;  %v592_v33 = vpop.f32.mrf.mxu1 }
 0x10e   : > { %658 = vst [vmem:[%s997_s22 + $0x188] sm:$0xff] %v428_v30  ;;  %660 = vst [vmem:[%s997_s22 + $0x198] sm:$0xff] %v589_v31  ;;  %v432_v34 = vadd.f32 %v431_v32, %v986_v48  ;;  %v593_v35 = vadd.f32 %v592_v33, %v988_v49 }
 0x10f   : > { %v433_v36 = vpop.f32.mrf.mxu0  ;;  %v594_v37 = vpop.f32.mrf.mxu1 }
 0x110   : > { %661 = vst [vmem:[%s997_s22 + $0x1a0] sm:$0xff] %v432_v34  ;;  %663 = vst [vmem:[%s997_s22 + $0x1b0] sm:$0xff] %v593_v35  ;;  %v434_v38 = vadd.f32 %v433_v36, %v990_v50  ;;  %v595_v39 = vadd.f32 %v594_v37, %v992_v51 }
 0x111   : > { %v437_v40 = vpop.f32.mrf.mxu0  ;;  %v598_v41 = vpop.f32.mrf.mxu1 }
 0x112   : > { %662 = vst [vmem:[%s997_s22 + $0x1a8] sm:$0xff] %v434_v38  ;;  %664 = vst [vmem:[%s997_s22 + $0x1b8] sm:$0xff] %v595_v39  ;;  %v438_v42 = vadd.f32 %v437_v40, %v986_v48  ;;  %v599_v43 = vadd.f32 %v598_v41, %v988_v49 }
 0x113   : > { %v439_v44 = vpop.f32.mrf.mxu0  ;;  %v600_v45 = vpop.f32.mrf.mxu1 }
 0x114   : > { %665 = vst [vmem:[%s997_s22 + $0x1c0] sm:$0xff] %v438_v42  ;;  %667 = vst [vmem:[%s997_s22 + $0x1d0] sm:$0xff] %v599_v43  ;;  %v440_v46 = vadd.f32 %v439_v44, %v990_v50  ;;  %v601_v47 = vadd.f32 %v600_v45, %v992_v51 }
 0x115   : > { %v443_v52 = vpop.f32.mrf.mxu0  ;;  %v604_v53 = vpop.f32.mrf.mxu1 }
 0x116   : > { %666 = vst [vmem:[%s997_s22 + $0x1c8] sm:$0xff] %v440_v46  ;;  %668 = vst [vmem:[%s997_s22 + $0x1d8] sm:$0xff] %v601_v47  ;;  %v444_v54 = vadd.f32 %v443_v52, %v986_v48  ;;  %v605_v55 = vadd.f32 %v604_v53, %v988_v49 }
 0x117   : > { %v445_v56 = vpop.f32.mrf.mxu0  ;;  %v606_v57 = vpop.f32.mrf.mxu1 }
 0x118   : > { %669 = vst [vmem:[%s997_s22 + $0x1e0] sm:$0xff] %v444_v54  ;;  %671 = vst [vmem:[%s997_s22 + $0x1f0] sm:$0xff] %v605_v55  ;;  %v446_v58 = vadd.f32 %v445_v56, %v990_v50  ;;  %v607_v59 = vadd.f32 %v606_v57, %v992_v51 }
 0x11a   : > { %670 = vst [vmem:[%s997_s22 + $0x1e8] sm:$0xff] %v446_v58  ;;  %672 = vst [vmem:[%s997_s22 + $0x1f8] sm:$0xff] %v607_v59 }
 0x11b PF: > { %s13_s12 = sadd.s32 1, %s791_s12  }
 0x11c   : > { %p10_p4 = scmp.ge.s32.totalorder %s13_s12, 4  }
 0x11e   :  { %12 = sbr.rel (!%p10_p4) target bundleno = 1 (0x1), region = 62 }

</bundles_post_ra>
